<compile_context>
chip_gen: v6e
topology: v6e:2x2x1
jax: 0.10.0
libtpu: 0.0.40
codegen_flags: <defaults>
</compile_context>

<pallas_src>
import numpy as np
import jax
import jax.numpy as jnp
from jax.experimental import pallas as pl
from jax.experimental.pallas import tpu as pltpu

# ------------------------- configuration (small shapes) -------------------------
NUM_IMAGES = 2
C_FEAT = 4                  # feature channels
H_FEAT = W_FEAT = 16        # feature map spatial size
IMG_H = IMG_W = 64          # image size  -> spatial_scale = 16/64 = 0.25
POOL = 7                    # MultiScaleRoIAlign output_size
SAMPLING_RATIO = 2
NUM_PROPS_PER_IMG = 8
REP_SIZE = 32               # box_head representation size
NUM_CLASSES = 5             # incl. background
SCORE_THRESH = 0.05
NMS_THRESH = 0.5
DETECTIONS_PER_IMG = 100
BOX_WEIGHTS = (10.0, 10.0, 5.0, 5.0)
BBOX_XFORM_CLIP = float(np.log(1000.0 / 16.0))
MIN_SIZE = 0.01

F_IN = C_FEAT * POOL * POOL          # 196 flattened RoI feature dim
F_PAD = 256                          # padded to a multiple of 128 (aligned MXU feed)
PRED_PAD = 128                       # fused predictor [cls|reg|qlt] padded to 128 lanes
META_W = 128                         # [x1 y1 x2 y2 img_h img_w 0...] per proposal row
OUT_W = 128                          # single lane-dense output slab

# output slab column layout
COL_BOX = 0                             # 4 : decoded + clipped boxes
COL_RAW = 4                             # NUM_CLASSES-1 : softmax foreground scores
COL_Q = COL_RAW + (NUM_CLASSES - 1)     # 1 : sigmoid(quality)
COL_KEEP = COL_Q + 1                    # 1 : small-box keep mask
COL_CLS = COL_KEEP + 1                  # NUM_CLASSES : raw class logits
COL_REG = COL_CLS + NUM_CLASSES         # 4 : raw box-regression deltas
COL_QLT = COL_REG + 4                   # 1 : raw quality logit
COLS_USED = COL_QLT + 1                 # 20


# ===================== Pallas kernel: fused head + predictor + decode + score =====================
def fused_roi_head_kernel(x_ref, meta_ref, w6_ref, b6_ref, w7_ref, b7_ref,
                          wp_ref, bp_ref, out_ref):
    # TwoMLPHead: fc6 + ReLU, fc7 + ReLU  (bf16 MXU inputs, f32 accumulation)
    h = jnp.dot(x_ref[...], w6_ref[...], preferred_element_type=jnp.float32) + b6_ref[...]
    h = jnp.maximum(h, 0.0)
    h = jnp.dot(h.astype(jnp.bfloat16), w7_ref[...],
                preferred_element_type=jnp.float32) + b7_ref[...]
    h = jnp.maximum(h, 0.0)

    # fused predictor: one 128-lane matmul for [cls | reg | qlt | 0-pad]
    pred = jnp.dot(h.astype(jnp.bfloat16), wp_ref[...],
                   preferred_element_type=jnp.float32) + bp_ref[...]
    logits = pred[:, 0:NUM_CLASSES]
    reg = pred[:, NUM_CLASSES:NUM_CLASSES + 4]
    qlt = pred[:, NUM_CLASSES + 4:NUM_CLASSES + 5]

    # box decode (BoxCoder.decode_single) + clip-to-image + small-box mask (f32)
    meta = meta_ref[...]
    wx, wy, ww, wh = BOX_WEIGHTS
    px1 = meta[:, 0:1]
    py1 = meta[:, 1:2]
    px2 = meta[:, 2:3]
    py2 = meta[:, 3:4]
    img_h = meta[:, 4:5]
    img_w = meta[:, 5:6]

    widths = px2 - px1
    heights = py2 - py1
    ctr_x = px1 + 0.5 * widths
    ctr_y = py1 + 0.5 * heights

    dx = reg[:, 0:1] * (1.0 / wx)
    dy = reg[:, 1:2] * (1.0 / wy)
    dw = jnp.minimum(reg[:, 2:3] * (1.0 / ww), BBOX_XFORM_CLIP)
    dh = jnp.minimum(reg[:, 3:4] * (1.0 / wh), BBOX_XFORM_CLIP)

    pcx = dx * widths + ctr_x
    pcy = dy * heights + ctr_y
    pw = jnp.exp(dw) * widths
    ph = jnp.exp(dh) * heights

    x1 = jnp.clip(pcx - 0.5 * pw, 0.0, img_w)
    x2 = jnp.clip(pcx + 0.5 * pw, 0.0, img_w)
    y1 = jnp.clip(pcy - 0.5 * ph, 0.0, img_h)
    y2 = jnp.clip(pcy + 0.5 * ph, 0.0, img_h)

    keep = jnp.logical_and((x2 - x1) >= MIN_SIZE,
                           (y2 - y1) >= MIN_SIZE).astype(jnp.float32)

    # softmax over classes (exp on EUP, approx reciprocal) + sigmoid(quality)
    m = jnp.max(logits, axis=-1, keepdims=True)
    e = jnp.exp(logits - m)
    sm = e * pl.reciprocal(jnp.sum(e, axis=-1, keepdims=True), approx=True)
    raw = sm[:, 1:]                                           # drop background column
    q = pl.reciprocal(1.0 + jnp.exp(-qlt), approx=True)       # sigmoid(quality)

    pad = jnp.zeros((x1.shape[0], OUT_W - COLS_USED), jnp.float32)
    out_ref[...] = jnp.concatenate(
        [x1, y1, x2, y2, raw, q, keep, logits, reg, qlt, pad], axis=-1)


def _round_up(v, m):
    return ((v + m - 1) // m) * m


def fused_roi_head(pooled_flat, meta, params):
    """pooled_flat: (N, F_IN) f32, meta: (N, 6) f32 -> (N, OUT_W) f32 slab."""
    n = pooled_flat.shape[0]
    tile_n = min(128, _round_up(n, 16))
    n_pad = _round_up(n, tile_n)
    grid = (n_pad // tile_n,)

    # lane/row padded activations, cast to bf16 for the MXU
    x = jnp.zeros((n_pad, F_PAD), jnp.bfloat16)
    x = x.at[:n, :F_IN].set(pooled_flat.astype(jnp.bfloat16))
    meta_p = jnp.zeros((n_pad, META_W), jnp.float32)
    meta_p = meta_p.at[:n, :meta.shape[1]].set(meta)

    # fc6 weight K-padded 196 -> 256; predictor weights fused + lane-padded to 128
    w6 = jnp.zeros((F_PAD, REP_SIZE), jnp.float32).at[:F_IN].set(params["w6"])
    w6 = w6.astype(jnp.bfloat16)
    b6 = params["b6"].reshape(1, REP_SIZE)
    w7 = params["w7"].astype(jnp.bfloat16)
    b7 = params["b7"].reshape(1, REP_SIZE)
    wp = jnp.zeros((REP_SIZE, PRED_PAD), jnp.float32)
    wp = wp.at[:, 0:NUM_CLASSES].set(params["wc"])
    wp = wp.at[:, NUM_CLASSES:NUM_CLASSES + 4].set(params["wr"])
    wp = wp.at[:, NUM_CLASSES + 4:NUM_CLASSES + 5].set(params["wq"])
    wp = wp.astype(jnp.bfloat16)
    bp = jnp.zeros((1, PRED_PAD), jnp.float32)
    bp = bp.at[:, 0:NUM_CLASSES].set(params["bc"].reshape(1, -1))
    bp = bp.at[:, NUM_CLASSES:NUM_CLASSES + 4].set(params["br"].reshape(1, -1))
    bp = bp.at[:, NUM_CLASSES + 4:NUM_CLASSES + 5].set(params["bq"].reshape(1, -1))

    const = lambda shape: pl.BlockSpec(shape, lambda i: (0, 0))
    rows = lambda shape: pl.BlockSpec(shape, lambda i: (i, 0))

    out = pl.pallas_call(
        fused_roi_head_kernel,
        grid=grid,
        in_specs=[
            rows((tile_n, F_PAD)),
            rows((tile_n, META_W)),
            const((F_PAD, REP_SIZE)), const((1, REP_SIZE)),
            const((REP_SIZE, REP_SIZE)), const((1, REP_SIZE)),
            const((REP_SIZE, PRED_PAD)), const((1, PRED_PAD)),
        ],
        out_specs=rows((tile_n, OUT_W)),
        out_shape=jax.ShapeDtypeStruct((n_pad, OUT_W), jnp.float32),
        compiler_params=pltpu.CompilerParams(dimension_semantics=("parallel",)),
    )(x, meta_p, w6, b6, w7, b7, wp, bp)
    return out[:n]


# ================================ RoIAlign (plain JAX glue) ================================
# TODO(synk): RoIAlign's bilinear gather is data-dependent; it stays in plain JAX (jitted),
#             writing pooled features that feed the fused Pallas kernel.
def roi_align(feat, rois, batch_idx, spatial_scale, output_size, sampling_ratio):
    B, C, H, W = feat.shape
    N = rois.shape[0]
    P, S = output_size, sampling_ratio
    feat_t = jnp.transpose(feat, (0, 2, 3, 1))          # (B, H, W, C)

    x1 = rois[:, 0] * spatial_scale
    y1 = rois[:, 1] * spatial_scale
    x2 = rois[:, 2] * spatial_scale
    y2 = rois[:, 3] * spatial_scale
    roi_w = jnp.maximum(x2 - x1, 1.0)
    roi_h = jnp.maximum(y2 - y1, 1.0)
    bin_w = roi_w / P
    bin_h = roi_h / P

    pidx = jnp.arange(P, dtype=jnp.float32)
    sidx = (jnp.arange(S, dtype=jnp.float32) + 0.5) / S
    g = pidx[:, None] + sidx[None, :]                   # (P, S)

    y = y1[:, None, None] + g[None] * bin_h[:, None, None]   # (N, P, S)
    x = x1[:, None, None] + g[None] * bin_w[:, None, None]   # (N, P, S)
    Y = jnp.broadcast_to(y[:, :, None, :, None], (N, P, P, S, S))
    X = jnp.broadcast_to(x[:, None, :, None, :], (N, P, P, S, S))

    valid = (Y >= -1.0) & (Y <= H) & (X >= -1.0) & (X <= W)
    Yc = jnp.clip(Y, 0.0, H - 1.0)
    Xc = jnp.clip(X, 0.0, W - 1.0)
    y0 = jnp.floor(Yc).astype(jnp.int32)
    x0 = jnp.floor(Xc).astype(jnp.int32)
    y1i = jnp.minimum(y0 + 1, H - 1)
    x1i = jnp.minimum(x0 + 1, W - 1)
    ly = Yc - y0.astype(jnp.float32)
    lx = Xc - x0.astype(jnp.float32)
    hy = 1.0 - ly
    hx = 1.0 - lx

    bidx = batch_idx[:, None, None, None, None]
    v00 = feat_t[bidx, y0, x0]
    v01 = feat_t[bidx, y0, x1i]
    v10 = feat_t[bidx, y1i, x0]
    v11 = feat_t[bidx, y1i, x1i]

    val = ((hy * hx)[..., None] * v00 + (hy * lx)[..., None] * v01 +
           (ly * hx)[..., None] * v10 + (ly * lx)[..., None] * v11)
    val = val * valid[..., None].astype(val.dtype)
    pooled = val.mean(axis=(3, 4))                       # (N, P, P, C)
    return jnp.transpose(pooled, (0, 3, 1, 2))           # (N, C, P, P)


# ======================== device-side forward (jitted: RoIAlign + fused kernel) ========================
@jax.jit
def _device_forward(feat, rois, batch_idx, imhw_rows, spatial_scale, params):
    pooled = roi_align(feat, rois, batch_idx, spatial_scale, POOL, SAMPLING_RATIO)
    pooled_flat = pooled.reshape(pooled.shape[0], -1)     # (N, C*P*P), torch.flatten order
    meta = jnp.concatenate([rois, imhw_rows], axis=-1)    # (N, 6)
    return fused_roi_head(pooled_flat, meta, params)      # (N, OUT_W) slab


# ================================ postprocess (host, numpy) ================================
def _nms(boxes, scores, thresh):
    if boxes.shape[0] == 0:
        return np.zeros((0,), dtype=np.int64)
    order = np.argsort(-scores)
    areas = (boxes[:, 2] - boxes[:, 0]) * (boxes[:, 3] - boxes[:, 1])
    suppressed = np.zeros(boxes.shape[0], dtype=bool)
    keep = []
    for idx in order:
        if suppressed[idx]:
            continue
        keep.append(idx)
        xx1 = np.maximum(boxes[idx, 0], boxes[:, 0])
        yy1 = np.maximum(boxes[idx, 1], boxes[:, 1])
        xx2 = np.minimum(boxes[idx, 2], boxes[:, 2])
        yy2 = np.minimum(boxes[idx, 3], boxes[:, 3])
        inter = np.maximum(0.0, xx2 - xx1) * np.maximum(0.0, yy2 - yy1)
        iou = inter / (areas[idx] + areas - inter + 1e-12)
        suppressed |= iou > thresh
        suppressed[idx] = True
    return np.asarray(keep, dtype=np.int64)


def _batched_nms(boxes, scores, classes, thresh):
    if boxes.shape[0] == 0:
        return np.zeros((0,), dtype=np.int64)
    offsets = classes.astype(np.float32) * (boxes.max() + 1.0)
    return _nms(boxes + offsets[:, None], scores, thresh)


def postprocess(out_slab, num_props_per_img):
    out_boxes, out_scores, out_classes = [], [], []
    nc1 = NUM_CLASSES - 1
    start = 0
    for n in num_props_per_img:
        blk = out_slab[start:start + n]
        start += n
        b = blk[:, COL_BOX:COL_BOX + 4]
        raw = blk[:, COL_RAW:COL_RAW + nc1]
        q = blk[:, COL_Q:COL_Q + 1]
        km = blk[:, COL_KEEP] > 0.5
        b, raw, q = b[km], raw[km], q[km]
        flat_raw = raw.reshape(-1)
        retained = np.nonzero(flat_raw > SCORE_THRESH)[0]
        final = (q * raw).reshape(-1)[retained]
        det_boxes = b[retained // nc1]
        det_classes = retained % nc1 + 1
        keep_nms = _batched_nms(det_boxes, final, det_classes, NMS_THRESH)[:DETECTIONS_PER_IMG]
        out_boxes.append(det_boxes[keep_nms])
        out_scores.append(final[keep_nms])
        out_classes.append(det_classes[keep_nms])
    return out_boxes, out_scores, out_classes


# ================================ full forward (inference) ================================
def fastrcnn_roi_heads_forward(feats, props_list, image_sizes, params):
    rois = jnp.concatenate(props_list, axis=0).astype(jnp.float32)
    batch_idx = jnp.concatenate(
        [jnp.full((p.shape[0],), i, dtype=jnp.int32) for i, p in enumerate(props_list)])
    imhw = jnp.concatenate(
        [jnp.tile(jnp.asarray([[float(h), float(w)]], jnp.float32), (p.shape[0], 1))
         for p, (h, w) in zip(props_list, image_sizes)], axis=0)
    spatial_scale = jnp.asarray(feats["0"].shape[2] / float(image_sizes[0][0]), jnp.float32)

    out_slab = _device_forward(feats["0"], rois, batch_idx, imhw, spatial_scale, params)
    jax.block_until_ready(out_slab)

    num_props = [int(p.shape[0]) for p in props_list]
    det_boxes, det_scores, det_classes = postprocess(np.asarray(out_slab), num_props)
    losses = None   # eval mode; TODO(synk): training losses not implemented
    return det_boxes, det_scores, det_classes, losses, out_slab


# ======================================== main ========================================
if __name__ == "__main__":
    key = jax.random.PRNGKey(0)
    ks = jax.random.split(key, 12)

    # deterministic parameters (TwoMLPHead + FastRCNN-style predictor with quality head)
    params = {
        "w6": jax.random.normal(ks[0], (F_IN, REP_SIZE), jnp.float32) * 0.05,
        "b6": jnp.zeros((1, REP_SIZE), jnp.float32),
        "w7": jax.random.normal(ks[1], (REP_SIZE, REP_SIZE), jnp.float32) * 0.05,
        "b7": jnp.zeros((1, REP_SIZE), jnp.float32),
        "wc": jax.random.normal(ks[2], (REP_SIZE, NUM_CLASSES), jnp.float32) * 0.05,
        "bc": jnp.zeros((1, NUM_CLASSES), jnp.float32),
        "wr": jax.random.normal(ks[3], (REP_SIZE, 4), jnp.float32) * 0.05,
        "br": jnp.zeros((1, 4), jnp.float32),
        "wq": jax.random.normal(ks[4], (REP_SIZE, 1), jnp.float32) * 0.05,
        "bq": jnp.zeros((1, 1), jnp.float32),
    }

    # inputs: single FPN level '0' in NCHW, proposals per image, image sizes
    feats = {"0": jax.random.normal(ks[5], (NUM_IMAGES, C_FEAT, H_FEAT, W_FEAT), jnp.float32)}
    xy1 = jax.random.uniform(ks[6], (NUM_IMAGES, NUM_PROPS_PER_IMG, 2), minval=0.0, maxval=40.0)
    wh = jax.random.uniform(ks[7], (NUM_IMAGES, NUM_PROPS_PER_IMG, 2), minval=6.0, maxval=20.0)
    xy2 = jnp.minimum(xy1 + wh, float(IMG_W))
    props_list = [jnp.concatenate([xy1[i], xy2[i]], axis=-1) for i in range(NUM_IMAGES)]
    image_sizes = [(IMG_H, IMG_W)] * NUM_IMAGES

    det_boxes, det_scores, det_classes, losses, out_slab = fastrcnn_roi_heads_forward(
        feats, props_list, image_sizes, params)
    jax.block_until_ready(out_slab)

    assert out_slab.shape == (NUM_IMAGES * NUM_PROPS_PER_IMG, OUT_W)
    assert len(det_boxes) == NUM_IMAGES
    for b, s, c in zip(det_boxes, det_scores, det_classes):
        assert b.ndim == 2 and b.shape[1] == 4
        assert s.shape[0] == b.shape[0] == c.shape[0]
    print("KERNEL_OK")
</pallas_src>

<mosaic_0001>
module attributes {stable_mosaic.version = 11 : i64} {
  func.func @fused_roi_head_kernel(%arg0: i32, %arg1: memref<16x256xbf16, #tpu.memory_space<vmem>>, %arg2: memref<16x128xf32, #tpu.memory_space<vmem>>, %arg3: memref<256x32xbf16, #tpu.memory_space<vmem>>, %arg4: memref<1x32xf32, #tpu.memory_space<vmem>>, %arg5: memref<32x32xbf16, #tpu.memory_space<vmem>>, %arg6: memref<1x32xf32, #tpu.memory_space<vmem>>, %arg7: memref<32x128xbf16, #tpu.memory_space<vmem>>, %arg8: memref<1x128xf32, #tpu.memory_space<vmem>>, %arg9: memref<16x128xf32, #tpu.memory_space<vmem>>) attributes {dimension_semantics = [#tpu.dimension_semantics<parallel>], iteration_bounds = array<i64: 1>, scalar_prefetch = 0 : i64, scratch_operands = 0 : i64, tpu.core_type = #tpu.core_type<tc>, window_params = [{transform_indices = @transform_0, window_bounds = array<i64: 16, 256>}, {transform_indices = @transform_1, window_bounds = array<i64: 16, 128>}, {pipeline_mode = #tpu.pipeline_mode<synchronous>, transform_indices = @transform_2, window_bounds = array<i64: 256, 32>}, {pipeline_mode = #tpu.pipeline_mode<synchronous>, transform_indices = @transform_3, window_bounds = array<i64: 1, 32>}, {pipeline_mode = #tpu.pipeline_mode<synchronous>, transform_indices = @transform_4, window_bounds = array<i64: 32, 32>}, {pipeline_mode = #tpu.pipeline_mode<synchronous>, transform_indices = @transform_5, window_bounds = array<i64: 1, 32>}, {pipeline_mode = #tpu.pipeline_mode<synchronous>, transform_indices = @transform_6, window_bounds = array<i64: 32, 128>}, {pipeline_mode = #tpu.pipeline_mode<synchronous>, transform_indices = @transform_7, window_bounds = array<i64: 1, 128>}, {transform_indices = @transform_8, window_bounds = array<i64: 16, 128>}]} {
    %c0 = arith.constant 0 : index
    %c0_0 = arith.constant 0 : index
    %0 = vector.load %arg1[%c0, %c0_0] : memref<16x256xbf16, #tpu.memory_space<vmem>>, vector<16x256xbf16>
    %c0_1 = arith.constant 0 : index
    %c0_2 = arith.constant 0 : index
    %1 = vector.load %arg3[%c0_1, %c0_2] : memref<256x32xbf16, #tpu.memory_space<vmem>>, vector<256x32xbf16>
    %cst = arith.constant dense<0.000000e+00> : vector<16x32xf32>
    %2 = tpu.matmul %0, %1, %cst {dimension_numbers = #tpu.dot_dimension_numbers<[1], [0], [0], [1], [0, 0, 1, 1], [], []>} : vector<16x256xbf16>, vector<256x32xbf16>, vector<16x32xf32> -> vector<16x32xf32>
    %c0_3 = arith.constant 0 : index
    %c0_4 = arith.constant 0 : index
    %3 = vector.load %arg4[%c0_3, %c0_4] : memref<1x32xf32, #tpu.memory_space<vmem>>, vector<1x32xf32>
    %4 = vector.broadcast %3 : vector<1x32xf32> to vector<16x32xf32>
    %5 = arith.addf %2, %4 : vector<16x32xf32>
    %cst_5 = arith.constant 0.000000e+00 : f32
    %6 = vector.broadcast %cst_5 : f32 to vector<16x32xf32>
    %7 = arith.maximumf %5, %6 : vector<16x32xf32>
    %8 = arith.truncf %7 : vector<16x32xf32> to vector<16x32xbf16>
    %c0_6 = arith.constant 0 : index
    %c0_7 = arith.constant 0 : index
    %9 = vector.load %arg5[%c0_6, %c0_7] : memref<32x32xbf16, #tpu.memory_space<vmem>>, vector<32x32xbf16>
    %cst_8 = arith.constant dense<0.000000e+00> : vector<16x32xf32>
    %10 = tpu.matmul %8, %9, %cst_8 {dimension_numbers = #tpu.dot_dimension_numbers<[1], [0], [0], [1], [0, 0, 1, 1], [], []>} : vector<16x32xbf16>, vector<32x32xbf16>, vector<16x32xf32> -> vector<16x32xf32>
    %c0_9 = arith.constant 0 : index
    %c0_10 = arith.constant 0 : index
    %11 = vector.load %arg6[%c0_9, %c0_10] : memref<1x32xf32, #tpu.memory_space<vmem>>, vector<1x32xf32>
    %12 = vector.broadcast %11 : vector<1x32xf32> to vector<16x32xf32>
    %13 = arith.addf %10, %12 : vector<16x32xf32>
    %cst_11 = arith.constant 0.000000e+00 : f32
    %14 = vector.broadcast %cst_11 : f32 to vector<16x32xf32>
    %15 = arith.maximumf %13, %14 : vector<16x32xf32>
    %16 = arith.truncf %15 : vector<16x32xf32> to vector<16x32xbf16>
    %c0_12 = arith.constant 0 : index
    %c0_13 = arith.constant 0 : index
    %17 = vector.load %arg7[%c0_12, %c0_13] : memref<32x128xbf16, #tpu.memory_space<vmem>>, vector<32x128xbf16>
    %cst_14 = arith.constant dense<0.000000e+00> : vector<16x128xf32>
    %18 = tpu.matmul %16, %17, %cst_14 {dimension_numbers = #tpu.dot_dimension_numbers<[1], [0], [0], [1], [0, 0, 1, 1], [], []>} : vector<16x32xbf16>, vector<32x128xbf16>, vector<16x128xf32> -> vector<16x128xf32>
    %c0_15 = arith.constant 0 : index
    %c0_16 = arith.constant 0 : index
    %19 = vector.load %arg8[%c0_15, %c0_16] : memref<1x128xf32, #tpu.memory_space<vmem>>, vector<1x128xf32>
    %20 = vector.broadcast %19 : vector<1x128xf32> to vector<16x128xf32>
    %21 = arith.addf %18, %20 : vector<16x128xf32>
    %22 = vector.extract_strided_slice %21 {offsets = [0, 0], sizes = [16, 5], strides = [1, 1]} : vector<16x128xf32> to vector<16x5xf32>
    %23 = vector.extract_strided_slice %21 {offsets = [0, 5], sizes = [16, 4], strides = [1, 1]} : vector<16x128xf32> to vector<16x4xf32>
    %24 = vector.extract_strided_slice %21 {offsets = [0, 9], sizes = [16, 1], strides = [1, 1]} : vector<16x128xf32> to vector<16x1xf32>
    %c0_17 = arith.constant 0 : index
    %c0_18 = arith.constant 0 : index
    %25 = vector.load %arg2[%c0_17, %c0_18] : memref<16x128xf32, #tpu.memory_space<vmem>>, vector<16x128xf32>
    %26 = vector.extract_strided_slice %25 {offsets = [0, 0], sizes = [16, 1], strides = [1, 1]} : vector<16x128xf32> to vector<16x1xf32>
    %27 = vector.extract_strided_slice %25 {offsets = [0, 1], sizes = [16, 1], strides = [1, 1]} : vector<16x128xf32> to vector<16x1xf32>
    %28 = vector.extract_strided_slice %25 {offsets = [0, 2], sizes = [16, 1], strides = [1, 1]} : vector<16x128xf32> to vector<16x1xf32>
    %29 = vector.extract_strided_slice %25 {offsets = [0, 3], sizes = [16, 1], strides = [1, 1]} : vector<16x128xf32> to vector<16x1xf32>
    %30 = vector.extract_strided_slice %25 {offsets = [0, 4], sizes = [16, 1], strides = [1, 1]} : vector<16x128xf32> to vector<16x1xf32>
    %31 = vector.extract_strided_slice %25 {offsets = [0, 5], sizes = [16, 1], strides = [1, 1]} : vector<16x128xf32> to vector<16x1xf32>
    %32 = arith.subf %28, %26 : vector<16x1xf32>
    %33 = arith.subf %29, %27 : vector<16x1xf32>
    %cst_19 = arith.constant 5.000000e-01 : f32
    %34 = vector.broadcast %cst_19 : f32 to vector<16x1xf32>
    %35 = arith.mulf %34, %32 : vector<16x1xf32>
    %36 = arith.addf %26, %35 : vector<16x1xf32>
    %cst_20 = arith.constant 5.000000e-01 : f32
    %37 = vector.broadcast %cst_20 : f32 to vector<16x1xf32>
    %38 = arith.mulf %37, %33 : vector<16x1xf32>
    %39 = arith.addf %27, %38 : vector<16x1xf32>
    %40 = vector.extract_strided_slice %23 {offsets = [0, 0], sizes = [16, 1], strides = [1, 1]} : vector<16x4xf32> to vector<16x1xf32>
    %cst_21 = arith.constant 1.000000e-01 : f32
    %41 = vector.broadcast %cst_21 : f32 to vector<16x1xf32>
    %42 = arith.mulf %40, %41 : vector<16x1xf32>
    %43 = vector.extract_strided_slice %23 {offsets = [0, 1], sizes = [16, 1], strides = [1, 1]} : vector<16x4xf32> to vector<16x1xf32>
    %cst_22 = arith.constant 1.000000e-01 : f32
    %44 = vector.broadcast %cst_22 : f32 to vector<16x1xf32>
    %45 = arith.mulf %43, %44 : vector<16x1xf32>
    %46 = vector.extract_strided_slice %23 {offsets = [0, 2], sizes = [16, 1], strides = [1, 1]} : vector<16x4xf32> to vector<16x1xf32>
    %cst_23 = arith.constant 2.000000e-01 : f32
    %47 = vector.broadcast %cst_23 : f32 to vector<16x1xf32>
    %48 = arith.mulf %46, %47 : vector<16x1xf32>
    %cst_24 = arith.constant 4.13516665 : f32
    %49 = vector.broadcast %cst_24 : f32 to vector<16x1xf32>
    %50 = arith.minimumf %48, %49 : vector<16x1xf32>
    %51 = vector.extract_strided_slice %23 {offsets = [0, 3], sizes = [16, 1], strides = [1, 1]} : vector<16x4xf32> to vector<16x1xf32>
    %cst_25 = arith.constant 2.000000e-01 : f32
    %52 = vector.broadcast %cst_25 : f32 to vector<16x1xf32>
    %53 = arith.mulf %51, %52 : vector<16x1xf32>
    %cst_26 = arith.constant 4.13516665 : f32
    %54 = vector.broadcast %cst_26 : f32 to vector<16x1xf32>
    %55 = arith.minimumf %53, %54 : vector<16x1xf32>
    %56 = arith.mulf %42, %32 : vector<16x1xf32>
    %57 = arith.addf %56, %36 : vector<16x1xf32>
    %58 = arith.mulf %45, %33 : vector<16x1xf32>
    %59 = arith.addf %58, %39 : vector<16x1xf32>
    %60 = math.exp %50 : vector<16x1xf32>
    %61 = arith.mulf %60, %32 : vector<16x1xf32>
    %62 = math.exp %55 : vector<16x1xf32>
    %63 = arith.mulf %62, %33 : vector<16x1xf32>
    %cst_27 = arith.constant 5.000000e-01 : f32
    %64 = vector.broadcast %cst_27 : f32 to vector<16x1xf32>
    %65 = arith.mulf %64, %61 : vector<16x1xf32>
    %66 = arith.subf %57, %65 : vector<16x1xf32>
    %cst_28 = arith.constant 0.000000e+00 : f32
    %67 = vector.broadcast %cst_28 : f32 to vector<16x1xf32>
    %68 = arith.maximumf %67, %66 : vector<16x1xf32>
    %69 = arith.minimumf %31, %68 : vector<16x1xf32>
    %cst_29 = arith.constant 5.000000e-01 : f32
    %70 = vector.broadcast %cst_29 : f32 to vector<16x1xf32>
    %71 = arith.mulf %70, %61 : vector<16x1xf32>
    %72 = arith.addf %57, %71 : vector<16x1xf32>
    %cst_30 = arith.constant 0.000000e+00 : f32
    %73 = vector.broadcast %cst_30 : f32 to vector<16x1xf32>
    %74 = arith.maximumf %73, %72 : vector<16x1xf32>
    %75 = arith.minimumf %31, %74 : vector<16x1xf32>
    %cst_31 = arith.constant 5.000000e-01 : f32
    %76 = vector.broadcast %cst_31 : f32 to vector<16x1xf32>
    %77 = arith.mulf %76, %63 : vector<16x1xf32>
    %78 = arith.subf %59, %77 : vector<16x1xf32>
    %cst_32 = arith.constant 0.000000e+00 : f32
    %79 = vector.broadcast %cst_32 : f32 to vector<16x1xf32>
    %80 = arith.maximumf %79, %78 : vector<16x1xf32>
    %81 = arith.minimumf %30, %80 : vector<16x1xf32>
    %cst_33 = arith.constant 5.000000e-01 : f32
    %82 = vector.broadcast %cst_33 : f32 to vector<16x1xf32>
    %83 = arith.mulf %82, %63 : vector<16x1xf32>
    %84 = arith.addf %59, %83 : vector<16x1xf32>
    %cst_34 = arith.constant 0.000000e+00 : f32
    %85 = vector.broadcast %cst_34 : f32 to vector<16x1xf32>
    %86 = arith.maximumf %85, %84 : vector<16x1xf32>
    %87 = arith.minimumf %30, %86 : vector<16x1xf32>
    %88 = arith.subf %75, %69 : vector<16x1xf32>
    %cst_35 = arith.constant 0.00999999977 : f32
    %89 = vector.broadcast %cst_35 : f32 to vector<16x1xf32>
    %90 = arith.cmpf oge, %88, %89 : vector<16x1xf32>
    %91 = arith.subf %87, %81 : vector<16x1xf32>
    %cst_36 = arith.constant 0.00999999977 : f32
    %92 = vector.broadcast %cst_36 : f32 to vector<16x1xf32>
    %93 = arith.cmpf oge, %91, %92 : vector<16x1xf32>
    %94 = arith.andi %90, %93 : vector<16x1xi1>
    %95 = arith.extui %94 : vector<16x1xi1> to vector<16x1xi32>
    %96 = arith.sitofp %95 : vector<16x1xi32> to vector<16x1xf32>
    %cst_37 = arith.constant dense<0xFF800000> : vector<16xf32>
    %97 = vector.multi_reduction <maximumf>, %22, %cst_37 [1] : vector<16x5xf32> to vector<16xf32>
    %98 = vector.shape_cast %97 : vector<16xf32> to vector<16x1xf32>
    %99 = vector.broadcast %98 : vector<16x1xf32> to vector<16x5xf32>
    %100 = arith.subf %22, %99 : vector<16x5xf32>
    %101 = math.exp %100 : vector<16x5xf32>
    %cst_38 = arith.constant dense<0.000000e+00> : vector<16xf32>
    %102 = vector.multi_reduction <add>, %101, %cst_38 [1] : vector<16x5xf32> to vector<16xf32>
    %103 = vector.shape_cast %102 : vector<16xf32> to vector<16x1xf32>
    %104 = tpu.reciprocal %103 {approx = true} : vector<16x1xf32> -> vector<16x1xf32>
    %105 = vector.broadcast %104 : vector<16x1xf32> to vector<16x5xf32>
    %106 = arith.mulf %101, %105 : vector<16x5xf32>
    %107 = vector.extract_strided_slice %106 {offsets = [0, 1], sizes = [16, 4], strides = [1, 1]} : vector<16x5xf32> to vector<16x4xf32>
    %cst_39 = arith.constant 0.000000e+00 : f32
    %108 = vector.broadcast %cst_39 : f32 to vector<16x1xf32>
    %109 = arith.subf %108, %24 : vector<16x1xf32>
    %110 = math.exp %109 : vector<16x1xf32>
    %cst_40 = arith.constant 1.000000e+00 : f32
    %111 = vector.broadcast %cst_40 : f32 to vector<16x1xf32>
    %112 = arith.addf %111, %110 : vector<16x1xf32>
    %113 = tpu.reciprocal %112 {approx = true} : vector<16x1xf32> -> vector<16x1xf32>
    %cst_41 = arith.constant 0.000000e+00 : f32
    %114 = vector.broadcast %cst_41 : f32 to vector<16x108xf32>
    %115 = tpu.concatenate %69, %81, %75, %87, %107, %113, %96, %22, %23, %24, %114 in 1 : vector<16x1xf32>, vector<16x1xf32>, vector<16x1xf32>, vector<16x1xf32>, vector<16x4xf32>, vector<16x1xf32>, vector<16x1xf32>, vector<16x5xf32>, vector<16x4xf32>, vector<16x1xf32>, vector<16x108xf32> -> vector<16x128xf32>
    %c0_42 = arith.constant 0 : index
    %c0_43 = arith.constant 0 : index
    %116 = vector.load %arg9[%c0_42, %c0_43] : memref<16x128xf32, #tpu.memory_space<vmem>>, vector<16x128xf32>
    tpu.vector_store %arg9[%c0_42, %c0_43], %115 {strides = array<i32>} : memref<16x128xf32, #tpu.memory_space<vmem>>, vector<16x128xf32>,
    return
  }
  func.func @transform_0(%arg0: i32) -> (i32, i32) {
    %c0_i32 = arith.constant 0 : i32
    %c0_i32_0 = arith.constant 0 : i32
    return %arg0, %c0_i32 : i32, i32
  }
  func.func @transform_1(%arg0: i32) -> (i32, i32) {
    %c0_i32 = arith.constant 0 : i32
    %c0_i32_0 = arith.constant 0 : i32
    return %arg0, %c0_i32 : i32, i32
  }
  func.func @transform_2(%arg0: i32) -> (i32, i32) {
    %c0_i32 = arith.constant 0 : i32
    %c0_i32_0 = arith.constant 0 : i32
    %c0_i32_1 = arith.constant 0 : i32
    return %c0_i32, %c0_i32_0 : i32, i32
  }
  func.func @transform_3(%arg0: i32) -> (i32, i32) {
    %c0_i32 = arith.constant 0 : i32
    %c0_i32_0 = arith.constant 0 : i32
    %c0_i32_1 = arith.constant 0 : i32
    return %c0_i32, %c0_i32_0 : i32, i32
  }
  func.func @transform_4(%arg0: i32) -> (i32, i32) {
    %c0_i32 = arith.constant 0 : i32
    %c0_i32_0 = arith.constant 0 : i32
    %c0_i32_1 = arith.constant 0 : i32
    return %c0_i32, %c0_i32_0 : i32, i32
  }
  func.func @transform_5(%arg0: i32) -> (i32, i32) {
    %c0_i32 = arith.constant 0 : i32
    %c0_i32_0 = arith.constant 0 : i32
    %c0_i32_1 = arith.constant 0 : i32
    return %c0_i32, %c0_i32_0 : i32, i32
  }
  func.func @transform_6(%arg0: i32) -> (i32, i32) {
    %c0_i32 = arith.constant 0 : i32
    %c0_i32_0 = arith.constant 0 : i32
    %c0_i32_1 = arith.constant 0 : i32
    return %c0_i32, %c0_i32_0 : i32, i32
  }
  func.func @transform_7(%arg0: i32) -> (i32, i32) {
    %c0_i32 = arith.constant 0 : i32
    %c0_i32_0 = arith.constant 0 : i32
    %c0_i32_1 = arith.constant 0 : i32
    return %c0_i32, %c0_i32_0 : i32, i32
  }
  func.func @transform_8(%arg0: i32) -> (i32, i32) {
    %c0_i32 = arith.constant 0 : i32
    %c0_i32_0 = arith.constant 0 : i32
    return %arg0, %c0_i32 : i32, i32
  }
}

</mosaic_0001>

<bundles_post_ra>
// kernel: _device_forward.1
= control target key start
LH: loop header
LB: loop body
LE: loop exit
PB: predicated region body
PF: predicated region fallthrough
CT: control target
= control target key end

     0   :  { %s1000_s0 = inlined_call_operand.vmem [shape: bf16[16,256], index: 0, kind: input, shape index: {}]   ;;  %s1001_s1 = inlined_call_operand.vmem [shape: f32[16,128], index: 1, kind: input, shape index: {}]   ;;  %s1002_s2 = inlined_call_operand.vmem [shape: bf16[256,32], index: 2, kind: input, shape index: {}]   ;;  %s1003_s3 = inlined_call_operand.vmem [shape: f32[1,32], index: 3, kind: input, shape index: {}]   ;;  %s1004_s4 = inlined_call_operand.vmem [shape: bf16[32,32], index: 4, kind: input, shape index: {}]   ;;  %s1005_s5 = inlined_call_operand.vmem [shape: f32[1,32], index: 5, kind: input, shape index: {}]   ;;  %s1006_s6 = inlined_call_operand.vmem [shape: bf16[32,128], index: 6, kind: input, shape index: {}]   ;;  %s1007_s7 = inlined_call_operand.vmem [shape: f32[1,128], index: 7, kind: input, shape index: {}]   ;;  %s1008_s8 = inlined_call_operand.hbm [shape: f32[16,128], index: 8, kind: output, shape index: {}]  }
   0x1   :  { %v725_v0 = vld [vmem:[%s1002_s2 + $0x78] sm:$0xff]   ;;  %v727_v2 = vld [vmem:[%s1002_s2 + $0x70] sm:$0xff]   ;;  %v729_v4 = vld [vmem:[%s1002_s2 + $0x68] sm:$0xff]  }
   0x2   :  { %v726_v1 = vld [vmem:[%s1002_s2 + $0x38] sm:$0xff]   ;;  %660 = vmatprep.subr.bf16.mxu0 %v725_v0  ;;  %v728_v3 = vld [vmem:[%s1002_s2 + $0x30] sm:$0xff]   ;;  %v730_v5 = vld [vmem:[%s1002_s2 + $0x28] sm:$0xff]  }
   0x3   :  { %661 = vmatpush3.bf16.msra.mxu0 %v726_v1  ;;  %v731_v6 = vld [vmem:[%s1002_s2 + $0x60] sm:$0xff]   ;;  %v733_v8 = vld [vmem:[%s1002_s2 + $0x58] sm:$0xff]   ;;  %v735_v10 = vld [vmem:[%s1002_s2 + $0x50] sm:$0xff]  }
   0x4   :  { %662 = vmatprep.subr.bf16.mxu0 %v727_v2  ;;  %v732_v7 = vld [vmem:[%s1002_s2 + $0x20] sm:$0xff]   ;;  %v734_v9 = vld [vmem:[%s1002_s2 + $0x18] sm:$0xff]   ;;  %v736_v11 = vld [vmem:[%s1002_s2 + $0x10] sm:$0xff]  }
   0x5   :  { %v743_v12 = vld [vmem:[%s1000_s0 + $0x4] ss:$8 sps:$4 sm:$0xff]  }
   0x6   :  { %210 = vmatprep.mubr.bf16.mxu0 %v743_v12  ;;  %v737_v13 = vld [vmem:[%s1002_s2 + $0x48] sm:$0xff]  }
   0x7   :  { %663 = vmatpush3.bf16.msra.mxu0 %v728_v3 }
   0x8   :  { %664 = vmatprep.subr.bf16.mxu0 %v729_v4 }
   0xb   :  { %665 = vmatpush3.bf16.msra.mxu0 %v730_v5 }
   0xc   :  { %666 = vmatprep.subr.bf16.mxu0 %v731_v6 }
   0xf   :  { %667 = vmatpush3.bf16.msra.mxu0 %v732_v7 }
  0x10   :  { %668 = vmatprep.subr.bf16.mxu0 %v733_v8 }
  0x13   :  { %669 = vmatpush3.bf16.msra.mxu0 %v734_v9 }
  0x14   :  { %670 = vmatprep.subr.bf16.mxu0 %v735_v10 }
  0x15   :  { %13 = vsyncpa [#allocation3], 0  ;;  %v738_v14 = vld [vmem:[%s1002_s2 + $0x8] sm:$0xff]   ;;  %v739_v15 = vld [vmem:[%s1002_s2 + $0x40] sm:$0xff]   ;;  %v790_v19 = vmov 0.0   ;;  %vm791_vm0 = vmmov 0  }
  0x16   :  { %v740_v16 = vld [vmem:[%s1002_s2] sm:$0xff]   ;;  %v744_v18 = vld [vmem:[%s1004_s4 + $0x8] sm:$0xff]   ;;  %688 = vmatprep.subr.bf16.mxu1 %v790_v19  ;;  %692 = vmatprep.mubr.msk.bf16.mxu1 %vm791_vm0, %v790_v19  ;;  %s792_s23 = smov 2   ;;  %vm245_vm1 = vcmask 261120   ;;  %s794_s30 = smov 5   ;;  %vm486_vm2 = vcmask 39936  }
  0x17   :  { %671 = vmatpush3.bf16.msra.mxu0 %v736_v11  ;;  %v741_v17 = vld [vmem:[%s1000_s0] ss:$8 sps:$4 sm:$0xff]   ;;  %689 = vmatpush3.bf16.msra.mxu1 %v744_v18  ;;  %s795_s9 = smov 3   ;;  %s799_s13 = smov 125   ;;  %vm583_vm11 = vcmask 7168   ;;  %vm586_vm12 = vcmask 15360  }
  0x18   :  { %672 = vmatprep.subr.bf16.mxu0 %v737_v13  ;;  %690 = vmatprep.subr.bf16.mxu1 %v790_v19  ;;  %v745_v20 = vld [vmem:[%s1004_s4] sm:$0xff]   ;;  %v925_v22 = vld [vmem:[%s1001_s1 + $0x8] sm:$0xff]  ;;  %s800_s14 = smov 127   ;;  %s801_s15 = smov 10   ;;  %vm589_vm13 = vcmask 23552   ;;  %vm592_vm14 = vcmask 31744  }
  0x19   :  { %v919_v21 = vld [vmem:[%s1001_s1] sm:$0xff]  ;;  %s793_s1 = smov 126   ;;  %v746_v41 = vld [vmem:[%s1006_s6 + $0x8] sm:$0xff]   ;;  %s802_s16 = smov 4   ;;  %vm595_vm15 = vcmask 64512  }
  0x1a   :  { %364 = vrot.lane.b32.xlu0 %v919_v21, %s792_s23  ;;  %v631_v28 = vld [vmem:[%s1003_s3] ss:$0 sm:$0xff]  ;;  %s803_s17 = smov [#allocation2]  }
  0x1b   :  { %673 = vmatpush3.bf16.msra.mxu0 %v738_v14  ;;  %691 = vmatpush3.bf16.msra.mxu1 %v745_v20  ;;  %v747_v42 = vld [vmem:[%s1006_s6] sm:$0xff]   ;;  %s620_s18 = sshll.u32 %s803_s17, 4  ;;  %s621_s18 = int_to_ptr.vmem [resolvable:$true] %s620_s18 }
  0x1c   :  { %674 = vmatprep.subr.bf16.mxu0 %v739_v15  ;;  %696 = vmatprep.subr.bf16.mxu1 %v790_v19  ;;  %v650_v47 = vld [vmem:[%s1005_s5] ss:$0 sm:$0xff]  ;;  %s797_s5 = smov 1   ;;  %s768_s19 = scalar_lea.vmem %s621_s18, 256 }
  0x1d   :  { %v654_v57 = vld [vmem:[%s1007_s7] ss:$0 sm:$0xff]  ;;  %s798_s7 = smov 123   ;;  %p769_p0 = scmp.ne.s32.totalorder %s621_s18, %s768_s19 }
  0x1e   :  { %366 = vrot.lane.b32.xlu0 %v925_v22, %s792_s23  ;;  %p773_p1 = scmp.lt.s32.totalorder %s621_s18, %s621_s18  ;;  %p774_p2 = scmp.lt.s32.totalorder %s768_s19, %s768_s19 }
  0x1f   :  { %675 = vmatpush3.bf16.msra.mxu0 %v740_v16 }
  0x20   :  { %p775_p3 = por %p774_p2, %p773_p1 }
  0x22   :  { %211 = vmatmul.mubr.bf16.vlgmr.msra.gmra.mxu0 %v741_v17  ;;  %p776_p4 = pnand %p775_p3, %p769_p0 }
  0x8c   :  { %v365_v25 = vpop.permute.xlu0 %364 }
  0x8d   :  { %v370_v27 = vsub.f32 %v919_v21, %v365_v25 }
  0x8f   :  { %v372_v30 = vmul.f32 0.5, %v370_v27  ;;  %414 = vrot.lane.b32.xlu0 %v370_v27, %s794_s30 }
  0x90   :  { %v367_v32 = vpop.permute.xlu0 %366 }
  0x91   :  { %v371_v35 = vsub.f32 %v925_v22, %v367_v32  ;;  %376 = vrot.lane.b32.xlu1 %v372_v30, %s793_s1 }
  0x93   :  { %v373_v37 = vmul.f32 0.5, %v371_v35  ;;  %392 = vrot.lane.b32.xlu0 %v370_v27, %s795_s9 }
  0x95   :  { %378 = vrot.lane.b32.xlu1 %v373_v37, %s793_s1 }
  0x99   :  { %416 = vrot.lane.b32.xlu1 %v371_v35, %s794_s30 }
  0x9d   :  { %394 = vrot.lane.b32.xlu1 %v371_v35, %s795_s9 }
  0xe2   :  { %v676_v23 = vpop.f32.mrf.mxu0 }
  0xe4   :  { %v677_v24 = vpop.f32.mrf.mxu0 }
  0xe5   :  { %v678_v26 = vadd.f32 %v677_v24, %v676_v23 }
  0xe6   :  { %v679_v29 = vpop.f32.mrf.mxu0 }
  0xe7   :  { %v213_v33 = vadd.f32 %v678_v26, %v631_v28 }
  0xe8   :  { %v680_v31 = vpop.f32.mrf.mxu0 }
  0xe9   :  { %v681_v34 = vadd.f32 %v680_v31, %v679_v29  ;;  %v219_v38 = vmax.f32 %v213_v33, 0.0 }
  0xeb   :  { %v216_v36 = vadd.f32 %v681_v34, %v631_v28 }
  0xed   :  { %v220_v39 = vmax.f32 %v216_v36, 0.0 }
  0xef   :  { %v221_v40 = vpack.c.bf16 %v220_v39, %v219_v38 }
  0xf1   :  { %693 = vmatmul.mubr.msk.bf16.vlgmr.msra.gmra.mxu1 %vm245_vm1, %v221_v40 }
  0xf2   :  { %700 = vmatprep.mubr.msk.bf16.mxu1 %vm791_vm0, %v790_v19  ;;  %697 = vmatpush3.bf16.msra.mxu1 %v746_v41  ;;  %vm598_vm0 = vcmask 72704  }
  0xf3   :  { %698 = vmatprep.subr.bf16.mxu1 %v790_v19 }
  0xf6   :  { %699 = vmatpush3.bf16.msra.mxu1 %v747_v42 }
 0x101   :  { %v415_v7 = vpop.permute.xlu0 %414 }
 0x103   :  { %v377_v43 = vpop.permute.xlu1 %376 }
 0x104   :  { %v382_v44 = vadd.f32 %v377_v43, %v919_v21 }
 0x105   :  { %v393_v16 = vpop.permute.xlu0 %392 }
 0x106   :  { %402 = vrot.lane.b32.xlu0 %v382_v44, %s794_s30 }
 0x107   :  { %v379_v45 = vpop.permute.xlu1 %378 }
 0x108   :  { %v383_v46 = vadd.f32 %v379_v45, %v925_v22 }
 0x10a   :  { %404 = vrot.lane.b32.xlu1 %v383_v46, %s794_s30 }
 0x10b   :  { %v417_v10 = vpop.permute.xlu1 %416 }
 0x10f   :  { %v395_v18 = vpop.permute.xlu1 %394 }
 0x178   :  { %v403_v24 = vpop.permute.xlu0 %402 }
 0x17c   :  { %v405_v27 = vpop.permute.xlu1 %404 }
 0x1b1   :  { %v283_v48 = vpop.f32.mrf.mxu1 }
 0x1b2   :  { %v284_v50 = vadd.f32 %v650_v47, %v283_v48 }
 0x1b3   :  { %v694_v49 = vpop.f32.mrf.mxu1 }
 0x1b4   :  { %v290_v54 = vmax.f32 %v284_v50, 0.0 }
 0x1b5   :  { %v286_v51 = vpop.f32.mrf.mxu1 }
 0x1b6   :  { %v287_v52 = vadd.f32 %v650_v47, %v286_v51 }
 0x1b7   :  { %v695_v53 = vpop.f32.mrf.mxu1 }
 0x1b8   :  { %v291_v55 = vmax.f32 %v287_v52, 0.0 }
 0x1ba   :  { %v292_v56 = vpack.c.bf16 %v291_v55, %v290_v54 }
 0x1bc   :  { %701 = vmatmul.mubr.msk.bf16.vlgmr.msra.gmra.mxu1 %vm245_vm1, %v292_v56  ;;  %vm601_vm1 = vcmask 80896  }
 0x27c   :  { %v353_v58 = vpop.f32.mrf.mxu1 }
 0x27d   :  { %v956_v59 = vadd.f32 %v654_v57, %v353_v58 }
 0x27e   :  { %v702_v60 = vpop.f32.mrf.mxu1 }
 0x27f   :  { %v386_v61 = vmul.f32 0.2, %v956_v59  ;;  %v487_v14 = vsel %vm486_vm2, %v956_v59, -inf  ;;  %v384_v17 = vmul.f32 0.1, %v956_v59  ;;  %v509_v49 = vsub.f32 0.0, %v956_v59 }
 0x280   :  { %v356_v62 = vpop.f32.mrf.mxu1 }
 0x281   :  { %v388_v63 = vmin.f32 %v386_v61, 4.1351666  ;;  %v959_v0 = vadd.f32 %v654_v57, %v356_v62  ;;  %v398_v23 = vmul.f32 %v393_v16, %v384_v17  ;;  %v511_v51 = vmul.f32 1.442695, %v509_v49 }
 0x282   :  { %v703_v1 = vpop.f32.mrf.mxu1 }
 0x283   :  { %v387_v2 = vmul.f32 0.2, %v959_v0  ;;  %v410_v3 = vmul.f32 1.442695, %v388_v63  ;;  %v490_v15 = vsel %vm486_vm2, %v959_v0, -inf  ;;  %v408_v26 = vadd.f32 %v403_v24, %v398_v23 }
 0x284   :  { %v385_v20 = vmul.f32 0.1, %v959_v0  ;;  %v510_v50 = vsub.f32 0.0, %v959_v0 }
 0x285   :  { %v389_v4 = vmin.f32 %v387_v2, 4.1351666  ;;  %748 = vpow2.f32 %v410_v3  ;;  %v796_v2 = vmov 0  }
 0x286   :  { %v399_v25 = vmul.f32 %v395_v18, %v385_v20  ;;  %v513_v52 = vmul.f32 1.442695, %v510_v50 }
 0x287   :  { %v412_v5 = vmul.f32 1.442695, %v389_v4 }
 0x288   :  { %v409_v30 = vadd.f32 %v405_v27, %v399_v25 }
 0x289   :  { %750 = vpow2.f32 %v412_v5 }
 0x292   :  { %v749_v6 = vpop.eup %748 }
 0x293   :  { %v420_v8 = vmul.f32 %v749_v6, %v415_v7 }
 0x295   :  { %v422_v11 = vmul.f32 0.5, %v420_v8 }
 0x296   :  { %v751_v9 = vpop.eup %750 }
 0x297   :  { %v421_v12 = vmul.f32 %v751_v9, %v417_v10  ;;  %426 = vrot.lane.b32.xlu0 %v422_v11, %s793_s1 }
 0x299   :  { %v423_v13 = vmul.f32 0.5, %v421_v12 }
 0x29b   :  { %428 = vrot.lane.b32.xlu1 %v423_v13, %s793_s1 }
 0x2b6   :  { %488 = vmax.xlane.f32.xlu0 %v487_v14 }
 0x2bf   :  { %491 = vmax.xlane.f32.xlu1 %v490_v15 }
 0x309   :  { %v427_v28 = vpop.permute.xlu0 %426 }
 0x30a   :  { %v432_v29 = vsub.f32 %v408_v26, %v427_v28  ;;  %v970_v32 = vadd.f32 %v427_v28, %v408_v26 }
 0x30c   :  { %v434_v31 = vmax.f32 %v432_v29, 0.0  ;;  %v440_v37 = vmax.f32 %v970_v32, 0.0 }
 0x30d   :  { %v429_v33 = vpop.permute.xlu1 %428 }
 0x30e   :  { %v433_v34 = vsub.f32 %v409_v30, %v429_v33  ;;  %446 = vrot.lane.b32.xlu0 %v434_v31, %s793_s1  ;;  %v439_v36 = vadd.f32 %v429_v33, %v409_v30  ;;  %v436_v6 = vmin.f32 %v919_v21, %v434_v31  ;;  %v442_v10 = vmin.f32 %v919_v21, %v440_v37 }
 0x310   :  { %v435_v35 = vmax.f32 %v433_v34, 0.0  ;;  %v441_v38 = vmax.f32 %v439_v36, 0.0 }
 0x312   :  { %448 = vrot.lane.b32.xlu1 %v435_v35, %s793_s1  ;;  %456 = vrot.lane.b32.xlu0 %v440_v37, %s793_s1  ;;  %v437_v9 = vmin.f32 %v925_v22, %v435_v35  ;;  %v443_v11 = vmin.f32 %v925_v22, %v441_v38 }
 0x314   :  { %v465_v23 = vsub.f32 %v443_v11, %v437_v9 }
 0x316   :  { %458 = vrot.lane.b32.xlu1 %v441_v38, %s793_s1  ;;  %vm467_vm8 = vcmp.ge.f32.partialorder %v465_v23, 0.01 }
 0x33f   :  { %v489_v39 = vpop.xlane.xlu0 %488 }
 0x340   :  { %v493_v40 = vsub.f32 %v956_v59, %v489_v39 }
 0x342   :  { %v495_v41 = vmul.f32 1.442695, %v493_v40 }
 0x344   :  { %752 = vpow2.f32 %v495_v41 }
 0x348   :  { %v492_v42 = vpop.xlane.xlu1 %491 }
 0x349   :  { %v494_v43 = vsub.f32 %v959_v0, %v492_v42 }
 0x34b   :  { %v497_v44 = vmul.f32 1.442695, %v494_v43 }
 0x34d   :  { %754 = vpow2.f32 %v497_v44 }
 0x34e   :  { %756 = vpow2.f32 %v511_v51 }
 0x34f   :  { %758 = vpow2.f32 %v513_v52 }
 0x351   :  { %v753_v45 = vpop.eup %752 }
 0x352   :  { %v499_v46 = vsel %vm486_vm2, %v753_v45, 0.0 }
 0x353   :  { %500 = vadd.xlane.f32.xlu0 %v499_v46 }
 0x35a   :  { %v755_v47 = vpop.eup %754 }
 0x35b   :  { %v502_v48 = vsel %vm486_vm2, %v755_v47, 0.0  ;;  %v757_v63 = vpop.eup %756  ;;  %vm604_vm2 = vcmask 121856  }
 0x35c   :  { %503 = vadd.xlane.f32.xlu1 %v502_v48  ;;  %v759_v4 = vpop.eup %758  ;;  %v515_v5 = vadd.f32 1.0, %v757_v63 }
 0x35d   :  { %v516_v8 = vadd.f32 1.0, %v759_v4 }
 0x35e   :  { %760 = vrcp.f32 %v515_v5 }
 0x35f   :  { %762 = vrcp.f32 %v516_v8 }
 0x36b   :  { %v761_v12 = vpop.eup %760 }
 0x36c   :  { %v763_v13 = vpop.eup %762 }
 0x380   :  { %v447_v53 = vpop.permute.xlu0 %446 }
 0x381   :  { %v452_v56 = vmin.f32 %v919_v21, %v447_v53 }
 0x384   :  { %v449_v54 = vpop.permute.xlu1 %448  ;;  %v457_v55 = vpop.permute.xlu0 %456 }
 0x385   :  { %v462_v57 = vmin.f32 %v919_v21, %v457_v55  ;;  %v453_v61 = vmin.f32 %v925_v22, %v449_v54 }
 0x387   :  { %v468_v58 = vsub.f32 %v462_v57, %v452_v56 }
 0x388   :  { %v459_v60 = vpop.permute.xlu1 %458 }
 0x389   :  { %v463_v62 = vmin.f32 %v925_v22, %v459_v60  ;;  %vm470_vm3 = vcmp.ge.f32.partialorder %v468_v58, 0.01  ;;  %v464_v22 = vsub.f32 %v442_v10, %v436_v6 }
 0x38a   :  { %v472_v3 = vsel %vm470_vm3, 1, %v796_v2  ;;  %vm607_vm3 = vcmask 154624  }
 0x38b   :  { %v469_v1 = vsub.f32 %v463_v62, %v453_v61  ;;  %474 = vrot.lane.b32.xlu0 %v472_v3, %s797_s5  ;;  %vm466_vm6 = vcmp.ge.f32.partialorder %v464_v22, 0.01 }
 0x38d   :  { %vm471_vm4 = vcmp.ge.f32.partialorder %v469_v1, 0.01 }
 0x38e   :  { %v473_v7 = vsel %vm471_vm4, 1, %v796_v2  ;;  %vm610_vm4 = vcmask 162816  }
 0x38f   :  { %476 = vrot.lane.b32.xlu1 %v473_v7, %s797_s5  ;;  %521 = vrot.lane.b32.xlu0 %v436_v6, %s798_s7 }
 0x393   :  { %523 = vrot.lane.b32.xlu1 %v437_v9, %s798_s7  ;;  %529 = vrot.lane.b32.xlu0 %v452_v56, %s799_s13 }
 0x397   :  { %531 = vrot.lane.b32.xlu1 %v453_v61, %s799_s13  ;;  %537 = vrot.lane.b32.xlu0 %v442_v10, %s799_s13 }
 0x39b   :  { %539 = vrot.lane.b32.xlu1 %v443_v11, %s799_s13  ;;  %545 = vrot.lane.b32.xlu0 %v462_v57, %s800_s14 }
 0x39f   :  { %547 = vrot.lane.b32.xlu1 %v463_v62, %s800_s14  ;;  %561 = vrot.lane.b32.xlu0 %v761_v12, %s800_s14 }
 0x3a3   :  { %563 = vrot.lane.b32.xlu1 %v763_v13, %s800_s14 }
 0x3dc   :  { %v501_v14 = vpop.xlane.xlu0 %500 }
 0x3dd   :  { %764 = vrcp.f32 %v501_v14 }
 0x3e5   :  { %v504_v15 = vpop.xlane.xlu1 %503 }
 0x3e6   :  { %766 = vrcp.f32 %v504_v15 }
 0x3ea   :  { %v765_v16 = vpop.eup %764 }
 0x3eb   :  { %v507_v17 = vmul.f32 %v765_v16, %v753_v45 }
 0x3ed   :  { %553 = vrot.lane.b32.xlu0 %v507_v17, %s795_s9 }
 0x3f3   :  { %v767_v21 = vpop.eup %766 }
 0x3f4   :  { %v508_v18 = vmul.f32 %v767_v21, %v755_v47 }
 0x3f6   :  { %555 = vrot.lane.b32.xlu1 %v508_v18, %s795_s9 }
 0x3fa   :  { %577 = vrot.lane.b32.xlu1 %v956_v59, %s801_s15 }
 0x3fd   :  { %v475_v20 = vpop.permute.xlu0 %474 }
 0x3fe   :  { %vm478_vm5 = vcmp.ne.s32.totalorder %v475_v20, 0 }
 0x3ff   :  { %vm480_vm7 = vmand %vm466_vm6, %vm478_vm5 }
 0x400   :  { %v658_v25 = vsel %vm480_vm7, 1.0, %v790_v19 }
 0x401   :  { %v477_v24 = vpop.permute.xlu1 %476  ;;  %v522_v59 = vpop.permute.xlu0 %521 }
 0x402   :  { %vm479_vm9 = vcmp.ne.s32.totalorder %v477_v24, 0 }
 0x403   :  { %vm481_vm10 = vmand %vm467_vm8, %vm479_vm9 }
 0x404   :  { %v659_v26 = vsel %vm481_vm10, 1.0, %v790_v19 }
 0x405   :  { %v720_v27 = vpack.i.bf16 %v659_v26, %v658_v25  ;;  %v524_v28 = vpop.permute.xlu1 %523  ;;  %v530_v29 = vpop.permute.xlu0 %529 }
 0x406   :  { %v584_v37 = vsel %vm583_vm11, %v522_v59, %v530_v29 }
 0x407   :  { %721 = vrot.lane.b32.xlu0 %v720_v27, %s802_s16 }
 0x409   :  { %v532_v30 = vpop.permute.xlu1 %531  ;;  %v538_v31 = vpop.permute.xlu0 %537 }
 0x40a   :  { %v585_v19 = vsel %vm583_vm11, %v524_v28, %v532_v30  ;;  %v587_v40 = vsel %vm586_vm12, %v584_v37, %v538_v31 }
 0x40b   :  { %579 = vrot.lane.b32.xlu0 %v959_v0, %s801_s15 }
 0x40d   :  { %v540_v32 = vpop.permute.xlu1 %539  ;;  %v546_v33 = vpop.permute.xlu0 %545 }
 0x40e   :  { %v588_v0 = vsel %vm586_vm12, %v585_v19, %v540_v32  ;;  %v590_v41 = vsel %vm589_vm13, %v587_v40, %v546_v33 }
 0x411   :  { %v548_v34 = vpop.permute.xlu1 %547  ;;  %v562_v35 = vpop.permute.xlu0 %561 }
 0x412   :  { %v591_v42 = vsel %vm589_vm13, %v588_v0, %v548_v34 }
 0x415   :  { %v564_v36 = vpop.permute.xlu1 %563 }
 0x45f   :  { %v554_v38 = vpop.permute.xlu0 %553 }
 0x460   :  { %v593_v43 = vsel %vm592_vm14, %v590_v41, %v554_v38 }
 0x461   :  { %v596_v48 = vsel %vm595_vm15, %v593_v43, %v562_v35 }
 0x468   :  { %v556_v39 = vpop.permute.xlu1 %555 }
 0x469   :  { %v594_v44 = vsel %vm592_vm14, %v591_v42, %v556_v39 }
 0x46a   :  { %v597_v49 = vsel %vm595_vm15, %v594_v44, %v564_v36 }
 0x46c   :  { %v578_v50 = vpop.permute.xlu1 %577 }
 0x479   :  { %v722_v45 = vpop.permute.xlu0 %721 }
 0x47a   :  { %v724_v46 = vunpack.i.h.bf16 %v722_v45  ;;  %v723_v47 = vunpack.i.l.bf16 %v722_v45 }
 0x47c   :  { %v599_v51 = vsel %vm598_vm0, %v596_v48, %v723_v47  ;;  %v600_v52 = vsel %vm598_vm0, %v597_v49, %v724_v46 }
 0x47d   :  { %v580_v53 = vpop.permute.xlu0 %579  ;;  %v602_v54 = vsel %vm601_vm1, %v599_v51, %v578_v50 }
 0x47e   :  { %v603_v55 = vsel %vm601_vm1, %v600_v52, %v580_v53  ;;  %v605_v56 = vsel %vm604_vm2, %v602_v54, %v578_v50 }
 0x47f   :  { %v606_v57 = vsel %vm604_vm2, %v603_v55, %v580_v53  ;;  %v608_v58 = vsel %vm607_vm3, %v605_v56, %v578_v50 }
 0x480   :  { %v609_v60 = vsel %vm607_vm3, %v606_v57, %v580_v53  ;;  %v611_v61 = vsel %vm610_vm4, %v608_v58, 0.0 }
 0x481   :  { %v612_v62 = vsel %vm610_vm4, %v609_v60, 0.0  ;;  %613 = vst [vmem:[#allocation2] sm:$0xff] %v611_v61 }
 0x482   :  { %614 = vst [vmem:[#allocation2 + $0x8] sm:$0xff] %v612_v62 }
 0x483   :  { %779 = shalt.err (!%p776_p4)
}
 0x484   :  { %s804_s20 = smov 128   ;;  %s805_s21 = smov 8  }
 0x485   :  { %626 = dma.vmem_to_hbm [thread:$0]  %s621_s18, 256, %s1008_s8, [#allocation3], %s804_s20, %s804_s20, %s805_s21  }
 0x486   :  { %788 = dma.done.wait [#allocation3], 256  }
 0x487   :  { %789 = vsyncadd [#allocation3], 4294967040 }
 0x488   :  { %630 = vsyncpa [#allocation3], 1 }

</bundles_post_ra>
